<compile_context>
chip_gen: v7x
topology: tpu7x:2x2x1
jax: 0.10.0
libtpu: 0.0.40
codegen_flags: <defaults>
</compile_context>

<pallas_src>
import jax
import jax.numpy as jnp
from jax.experimental import pallas as pl
from jax.experimental.pallas import tpu as pltpu


LANES = 128                      # TPU vreg lane width
MAX_LANE_WIDTH = 4096            # lane-dense staging width (multiple of 128)
TILE_TARGET_BYTES = 2 * 1024 * 1024   # ~2 MiB per pipeline tile
SMALL_BYTES = 1 * 1024 * 1024    # below this: single whole-array block, no grid


def _copy_kernel(x_ref, o_ref):
    # Pure pass-through: the identity op that realizes the view's data path.
    o_ref[...] = x_ref[...]


def _native_sublanes(dtype):
    """Native sublane packing for the dtype (f32: 8, bf16: 16, int8/fp8: 32)."""
    itemsize = jnp.dtype(dtype).itemsize
    if itemsize >= 4:
        return 8
    return 8 * (4 // itemsize)


def _choose_2d(n, dtype):
    """Pick (R, C) with R*C == n, C a multiple of 128 (lane-dense, as wide as
    possible up to MAX_LANE_WIDTH) and R a multiple of the native sublane
    packing (dense vreg tiles). Returns None if no aligned factorization."""
    sub = _native_sublanes(dtype)
    best = None
    c = LANES
    limit = min(n, MAX_LANE_WIDTH)
    while c <= limit:
        if n % c == 0 and (n // c) % sub == 0:
            best = (n // c, c)   # keep the widest valid C
        c += LANES
    return best


def _whole_array_copy(x2d):
    """Single-invocation copy: whole array resident in VMEM, no grid, no
    pipelining overhead. Use only for small inputs."""
    return pl.pallas_call(
        _copy_kernel,
        out_shape=jax.ShapeDtypeStruct(x2d.shape, x2d.dtype),
    )(x2d)


def _tiled_copy(x2d):
    """Auto-pipelined copy with large lane-dense tiles (~2 MiB each)."""
    R, C = x2d.shape
    dtype = x2d.dtype
    sub = _native_sublanes(dtype)
    itemsize = jnp.dtype(dtype).itemsize

    # ~2 MiB tiles: (in + out) x 2 pipeline buffers ~= 8 MiB VMEM, comfortably
    # inside the scoped default on all of v5e/v6e/v7x -> no vmem_limit bump.
    target_rows = max(sub, TILE_TARGET_BYTES // (C * itemsize))
    tr = max(sub, (target_rows // sub) * sub)
    tr = min(tr, R)

    # Prefer a tile height that divides R exactly (no ragged last block); fall
    # back to cdiv + masked writes on the last block if no nearby divisor.
    tr_div = tr
    while tr_div > sub and R % tr_div != 0:
        tr_div -= sub
    if R % tr_div == 0 and tr_div * 2 >= tr:
        tr = tr_div

    grid = (pl.cdiv(R, tr),)
    return pl.pallas_call(
        _copy_kernel,
        out_shape=jax.ShapeDtypeStruct((R, C), dtype),
        grid_spec=pltpu.PrefetchScalarGridSpec(
            num_scalar_prefetch=0,
            grid=grid,
            in_specs=[pl.BlockSpec((tr, C), lambda i: (i, 0))],
            out_specs=pl.BlockSpec((tr, C), lambda i: (i, 0)),
        ),
        compiler_params=pltpu.CompilerParams(
            dimension_semantics=("parallel",),  # shards grid over 2 TCs on v7x
        ),
    )(x2d)


def pallas_view(x, shape):
    """Equivalent of PyTorch `x.view(*shape)` with the data movement done
    inside a Pallas TPU copy kernel (reshape itself is metadata-only glue)."""
    target_shape = tuple(int(d) for d in shape)

    # --- glue: flatten row-major (identical element order to torch.view) ---
    flat = x.reshape(-1)           # metadata-only, no HBM pass
    n = flat.shape[0]

    # torch.view semantics: numel must match; support a single -1 dim.
    if -1 in target_shape:
        known = 1
        for d in target_shape:
            if d != -1:
                known *= d
        target_shape = tuple(n // known if d == -1 else d for d in target_shape)
    tgt_numel = 1
    for d in target_shape:
        tgt_numel *= d
    assert tgt_numel == n, f"view shape {target_shape} incompatible with numel {n}"

    nbytes = n * jnp.dtype(x.dtype).itemsize
    shape2d = _choose_2d(n, x.dtype)

    if shape2d is None:
        # TODO(synk): numel has no 128-aligned factorization; a very large
        # unaligned input would need a masked chunked path instead of one block.
        out2d = _whole_array_copy(flat.reshape(1, n))
    elif nbytes <= SMALL_BYTES:
        out2d = _whole_array_copy(flat.reshape(shape2d))
    else:
        out2d = _tiled_copy(flat.reshape(shape2d))

    # --- glue: apply the target (view) shape; metadata-only, no HBM pass ---
    return out2d.reshape(target_shape)


class ViewPallas:
    """Mirror of the PyTorch `View(nn.Module)`: stores a single shape value
    (an int in the original usage) and flattens/reshapes the input to it."""

    def __init__(self, shape):
        self.shape = (shape,)

    def __call__(self, x):
        return pallas_view(x, self.shape)


if __name__ == "__main__":
    key = jax.random.PRNGKey(0)

    # Small NCHW input consistent with the GAN usage: (2, 4, 16, 16) -> view(2048).
    x = jax.random.normal(key, (2, 4, 16, 16), dtype=jnp.float32)
    view = ViewPallas(2 * 4 * 16 * 16)
    y = jax.block_until_ready(view(x))
    ref = x.reshape(2 * 4 * 16 * 16)
    assert y.shape == ref.shape, (y.shape, ref.shape)
    assert y.dtype == ref.dtype
    assert bool(jnp.all(y == ref))

    # Larger aligned input to exercise the tiled, multi-step, lane-dense path.
    x2 = jax.random.normal(jax.random.PRNGKey(0), (8, 8, 128, 128),
                           dtype=jnp.float32)
    y2 = jax.block_until_ready(pallas_view(x2, (8 * 8 * 128 * 128,)))
    ref2 = x2.reshape(-1)
    assert y2.shape == ref2.shape
    assert bool(jnp.all(y2 == ref2))

    print("KERNEL_OK")
</pallas_src>

<mosaic_0001>
module attributes {stable_mosaic.version = 11 : i64} {
  func.func @_copy_kernel(%arg0: memref<8x256xf32, #tpu.memory_space<vmem>>, %arg1: memref<8x256xf32, #tpu.memory_space<vmem>>) attributes {dimension_semantics = [], scalar_prefetch = 0 : i64, scratch_operands = 0 : i64, tpu.core_type = #tpu.core_type<tc>} {
    %c0 = arith.constant 0 : index
    %c0_0 = arith.constant 0 : index
    %0 = vector.load %arg0[%c0, %c0_0] : memref<8x256xf32, #tpu.memory_space<vmem>>, vector<8x256xf32>
    %c0_1 = arith.constant 0 : index
    %c0_2 = arith.constant 0 : index
    %1 = vector.load %arg1[%c0_1, %c0_2] : memref<8x256xf32, #tpu.memory_space<vmem>>, vector<8x256xf32>
    tpu.vector_store %arg1[%c0_1, %c0_2], %0 {strides = array<i32>} : memref<8x256xf32, #tpu.memory_space<vmem>>, vector<8x256xf32>,
    return
  }
}

</mosaic_0001>

<bundles_post_ra>
// kernel: tpu_custom_call.1
= control target key start
LH: loop header
LB: loop body
LE: loop exit
PB: predicated region body
PF: predicated region fallthrough
CT: control target
= control target key end

     0   :  { %6 = vsyncpa [#allocation3], 0  ;;  %s126_s0 = inlined_call_operand.hbm [shape: f32[8,256], index: 0, kind: input, shape index: {}]   ;;  %s127_s1 = inlined_call_operand.hbm [shape: f32[8,256], index: 1, kind: output, shape index: {}]  }
   0x1   :  { %7 = vsyncpa [#allocation4], 0  ;;  %s90_s6 = smov [#allocation2]   ;;  %s42_s10 = scalar_lea.hbm %s126_s0, 256 }
   0x2   :  { %s14_s7 = sshll.u32 %s90_s6, 4  ;;  %p43_p0 = scmp.ne.s32.totalorder %s126_s0, %s42_s10  ;;  %s15_s7 = int_to_ptr.vmem [resolvable:$true] %s14_s7 }
   0x3   :  { %p46_p1 = scmp.lt.u32.totalorder %s42_s10, %s126_s0 }
   0x5   :  { %p48_p2 = pnand %p46_p1, %p43_p0 }
   0x7   :  { %51 = shalt.err (!%p48_p2)
}
   0x8   :  { %s52_s15 = scalar_lea.vmem %s15_s7, 256  ;;  %p57_p4 = scmp.lt.s32.totalorder %s15_s7, %s15_s7 }
   0x9   :  { %p53_p3 = scmp.ne.s32.totalorder %s15_s7, %s52_s15  ;;  %p58_p5 = scmp.lt.s32.totalorder %s52_s15, %s52_s15 }
   0xb   :  { %p59_p6 = por %p58_p5, %p57_p4 }
   0xd   :  { %p60_p7 = pnand %p59_p6, %p53_p3 }
   0xf   :  { %63 = shalt.err (!%p60_p7)
}
  0x10   :  { %17 = dma.hbm_to_vmem [thread:$0]  %s126_s0, 256, %s15_s7, [#allocation3]  }
  0x11   :  { %86 = dma.done.wait [#allocation3], 256  }
  0x12   :  { %87 = vsyncadd [#allocation3], 4294967040  ;;  %s91_s18 = smov [#allocation5]   ;;  %v21_v0 = vld [vmem:[#allocation2] sm:$0xff]  ;;  %v22_v1 = vld [vmem:[#allocation2 + $0x8] sm:$0xff] }
  0x13   :  { %s31_s19 = sshll.u32 %s91_s18, 4  ;;  %23 = vst [vmem:[#allocation5] sm:$0xff] %v21_v0  ;;  %24 = vst [vmem:[#allocation5 + $0x8] sm:$0xff] %v22_v1  ;;  %s32_s19 = int_to_ptr.vmem [resolvable:$true] %s31_s19 }
  0x14   :  { %s64_s20 = scalar_lea.vmem %s32_s19, 256  ;;  %p69_p9 = scmp.lt.s32.totalorder %s32_s19, %s32_s19 }
  0x15   :  { %p65_p8 = scmp.ne.s32.totalorder %s32_s19, %s64_s20  ;;  %p70_p10 = scmp.lt.s32.totalorder %s64_s20, %s64_s20 }
  0x17   :  { %p71_p11 = por %p70_p10, %p69_p9 }
  0x19   :  { %p72_p12 = pnand %p71_p11, %p65_p8 }
  0x1b   :  { %75 = shalt.err (!%p72_p12)
}
  0x1c   :  { %s76_s0 = scalar_lea.hbm %s127_s1, 256 }
  0x1d   :  { %p77_p13 = scmp.ne.s32.totalorder %s127_s1, %s76_s0  ;;  %p80_p0 = scmp.lt.u32.totalorder %s76_s0, %s127_s1 }
  0x1f   :  { %p82_p1 = pnand %p80_p0, %p77_p13 }
  0x21   :  { %85 = shalt.err (!%p82_p1)
}
  0x22   :  { %34 = dma.vmem_to_hbm [thread:$0]  %s32_s19, 256, %s127_s1, [#allocation4]  }
  0x23   :  { %88 = dma.done.wait [#allocation4], 256  }
  0x24   :  { %89 = vsyncadd [#allocation4], 4294967040 }
  0x25   :  { %38 = vsyncpa [#allocation3], 1 }
  0x26   :  { %39 = vsyncpa [#allocation4], 1 }

</bundles_post_ra>
